<compile_context>
chip_gen: v5e
topology: v5e:2x2
jax: 0.10.0
libtpu: 0.0.40
codegen_flags: <defaults>
</compile_context>

<pallas_src>
import functools

import jax
import jax.numpy as jnp
from jax.experimental import pallas as pl
from jax.experimental.pallas import tpu as pltpu


# --------------------- generic tiled matmul + bias (MXU) -------------------- #

def _matmul_bias_kernel(x_ref, w_ref, b_ref, o_ref):
    o_ref[...] = (
        jnp.dot(x_ref[...], w_ref[...], preferred_element_type=jnp.float32)
        + b_ref[...]
    ).astype(o_ref.dtype)


def matmul_bias(x, w, b, *, tm=256, tn=512):
    """Pallas (M,K)@(K,N) + (1,N) bias -> (M,N).

    Tiles M/N (both marked "parallel" so v7x can split across TensorCores) when
    they divide the tile size; otherwise falls back to the full dimension,
    which keeps the (8,128) block constraint satisfied for small demo shapes.
    K is kept whole (fits VMEM at these model sizes).
    """
    M, K = x.shape
    N = w.shape[1]
    bm = tm if M % tm == 0 else M
    bn = tn if N % tn == 0 else N
    return pl.pallas_call(
        _matmul_bias_kernel,
        out_shape=jax.ShapeDtypeStruct((M, N), jnp.float32),
        grid=(M // bm, N // bn),
        in_specs=[pl.BlockSpec((bm, K), lambda i, j: (i, 0)),
                  pl.BlockSpec((K, bn), lambda i, j: (0, j)),
                  pl.BlockSpec((1, bn), lambda i, j: (0, j))],
        out_specs=pl.BlockSpec((bm, bn), lambda i, j: (i, j)),
        compiler_params=pltpu.CompilerParams(
            dimension_semantics=("parallel", "parallel")),
        cost_estimate=pl.CostEstimate(
            flops=2 * M * N * K,
            transcendentals=0,
            bytes_accessed=4 * (M * K + K * N + N + M * N)),
    )(x, w, b)


# ----------------------------- Encoder (stand-in) --------------------------- #

def encoder_forward(images, w_patch, b_patch, patch_size):
    """images: (B, C, H, W) NCHW -> features: (B, P, encoder_dim)."""
    B, C, H, W = images.shape
    ps = patch_size
    hp, wp = H // ps, W // ps
    P = hp * wp
    # NCHW -> (B*P, C*ps*ps) non-overlapping patches (glue reshape/transpose);
    # same (B, num_pixels, encoder_dim) layout as Encoder.forward produces.
    patches = images.reshape(B, C, hp, ps, wp, ps)
    patches = patches.transpose(0, 2, 4, 1, 3, 5).reshape(B * P, C * ps * ps)
    enc_dim = w_patch.shape[1]
    feats = matmul_bias(patches, w_patch, b_patch)
    return feats.reshape(B, P, enc_dim)


# ------------------------- LSTM recurrence kernel --------------------------- #

def _lstm_recurrence_kernel(emb_gates_ref, ctx_gates_ref, h0_ref, c0_ref,
                            w_hh_ref, hs_ref, *, seq_len, decoder_dim):
    """Only the truly sequential work: gates = pre[s] + h @ w_hh, gate math.

    emb_gates_ref : (S, B, 4D)  precomputed emb @ w_ih[:E]  (per timestep)
    ctx_gates_ref : (B, 4D)     precomputed ctx @ w_ih[E:] + b_ih + b_hh
    h0/c0         : (B, D)      init_hidden_state outputs
    w_hh          : (D, 4D)
    hs_ref        : (S, B, D)   per-step hidden states (vocab proj done later)
    """
    D = decoder_dim
    w_hh = w_hh_ref[...]           # hoisted loads (loop-invariant)
    ctx_gates = ctx_gates_ref[...]

    def step(s, carry):
        h, c = carry
        gates = (emb_gates_ref[s] + ctx_gates
                 + jnp.dot(h, w_hh, preferred_element_type=jnp.float32))
        # PyTorch LSTMCell gate order: i, f, g, o
        i_g = jax.nn.sigmoid(gates[:, 0 * D:1 * D])
        f_g = jax.nn.sigmoid(gates[:, 1 * D:2 * D])
        g_g = jnp.tanh(gates[:, 2 * D:3 * D])
        o_g = jax.nn.sigmoid(gates[:, 3 * D:4 * D])
        c_new = f_g * c + i_g * g_g
        h_new = o_g * jnp.tanh(c_new)
        hs_ref[s] = h_new
        return (h_new, c_new)

    # Short, fixed trip count -> fully unroll for LLO scheduler visibility.
    jax.lax.fori_loop(0, seq_len, step, (h0_ref[...], c0_ref[...]),
                      unroll=True)


# --------------------------------- Decoder ---------------------------------- #

def decoder_forward(features, captions, params):
    B, P, Enc = features.shape
    T = captions.shape[1]
    seq_len = T - 1
    D = params['w_init_h'].shape[1]
    V = params['w_fc'].shape[1]
    E = params['w_emb'].shape[1]

    # ---- hoisted, non-recurrent compute ----
    # Softmax over a size-1 axis == 1.0 exactly, so the per-step context vector
    # is the constant per-image sum of encoder features.
    feat_sum = jnp.sum(features, axis=1)                       # (B, Enc)
    mean_feat = feat_sum / jnp.float32(P)                      # (B, Enc)

    # init_h / init_c fused into one MXU matmul.
    w_init = jnp.concatenate([params['w_init_h'], params['w_init_c']], axis=1)
    b_init = jnp.concatenate([params['b_init_h'], params['b_init_c']], axis=1)
    hc0 = matmul_bias(mean_feat, w_init, b_init)               # (B, 2D)
    h0, c0 = hc0[:, :D], hc0[:, D:]

    # Embedding lookup (glue gather) for the timesteps actually used.
    emb = jnp.take(params['w_emb'], captions[:, :seq_len], axis=0)  # (B, S, E)
    emb_t = jnp.transpose(emb, (1, 0, 2))                      # (S, B, E)

    # Non-recurrent halves of the LSTM input projection, batched over all
    # timesteps (one big MXU matmul) + one small context matmul.  This also
    # removes the per-step lane-axis concatenate.
    w_ih_emb = params['w_ih'][:E, :]                           # (E, 4D)
    w_ih_ctx = params['w_ih'][E:, :]                           # (Enc, 4D)
    zero_b = jnp.zeros((1, 4 * D), jnp.float32)
    emb_gates = matmul_bias(emb_t.reshape(seq_len * B, E), w_ih_emb, zero_b)
    emb_gates = emb_gates.reshape(seq_len, B, 4 * D)           # (S, B, 4D)
    ctx_gates = matmul_bias(feat_sum, w_ih_ctx,
                            params['b_ih'] + params['b_hh'])   # (B, 4D)

    # ---- recurrent core: single Pallas invocation, in-kernel time loop ----
    def full_spec(arr):
        nd = arr.ndim
        return pl.BlockSpec(arr.shape, lambda s, _nd=nd: (0,) * _nd)

    rec_inputs = (emb_gates, ctx_gates, h0, c0, params['w_hh'])
    hs = pl.pallas_call(
        functools.partial(_lstm_recurrence_kernel,
                          seq_len=seq_len, decoder_dim=D),
        out_shape=jax.ShapeDtypeStruct((seq_len, B, D), jnp.float32),
        grid=(1,),
        in_specs=[full_spec(a) for a in rec_inputs],
        out_specs=pl.BlockSpec((seq_len, B, D), lambda s: (0, 0, 0)),
        compiler_params=pltpu.CompilerParams(
            dimension_semantics=("arbitrary",)),
        cost_estimate=pl.CostEstimate(
            flops=2 * seq_len * B * D * 4 * D + 10 * seq_len * B * D,
            transcendentals=5 * seq_len * B * D,
            bytes_accessed=4 * (seq_len * B * 4 * D + B * 4 * D + 2 * B * D
                                + D * 4 * D + seq_len * B * D)),
    )(*rec_inputs)

    # ---- vocabulary projection hoisted out of the loop: one MXU matmul ----
    logits = matmul_bias(hs.reshape(seq_len * B, D),
                         params['w_fc'], params['b_fc'])       # (S*B, V)
    preds = jnp.transpose(logits.reshape(seq_len, B, V), (1, 0, 2))

    # softmax over a size-1 axis is exactly 1.0 -> the attention map the
    # PyTorch forward returns is a constant-ones tensor.
    attn = jnp.ones((B, seq_len, P), jnp.float32)
    return preds, attn


def cnn2rnn_forward(images, captions, params, patch_size):
    features = encoder_forward(images, params['w_patch'], params['b_patch'],
                               patch_size)
    return decoder_forward(features, captions, params)


# ------------------------------ Param setup --------------------------------- #

def init_params(key, *, embedding_size, attention_dim, encoder_dim,
                decoder_dim, vocab_size, patch_dim):
    keys = jax.random.split(key, 18)

    def u(k, shape, scale=0.1):
        return jax.random.uniform(k, shape, jnp.float32, -scale, scale)

    return {
        # encoder stand-in (patch embedding)
        'w_patch': u(keys[0], (patch_dim, encoder_dim)),
        'b_patch': u(keys[1], (1, encoder_dim)),
        # nn.Embedding(vocab, E), uniform(-0.1, 0.1) per init_weights
        'w_emb': u(keys[2], (vocab_size, embedding_size)),
        # init_h / init_c
        'w_init_h': u(keys[3], (encoder_dim, decoder_dim)),
        'b_init_h': u(keys[4], (1, decoder_dim)),
        'w_init_c': u(keys[5], (encoder_dim, decoder_dim)),
        'b_init_c': u(keys[6], (1, decoder_dim)),
        # BahdanuAttention linears: kept for structural parity, but they are
        # mathematically dead in this forward (softmax over a size-1 axis).
        'w_da': u(keys[7], (decoder_dim, attention_dim)),
        'b_da': u(keys[8], (1, attention_dim)),
        'w_ea': u(keys[9], (encoder_dim, attention_dim)),
        'b_ea': u(keys[10], (1, attention_dim)),
        'w_fa': u(keys[11], (attention_dim, 1)),
        'b_fa': u(keys[12], (1, 1)),
        # LSTMCell (stored pre-transposed: (in, 4*hidden))
        'w_ih': u(keys[13], (embedding_size + encoder_dim, 4 * decoder_dim)),
        'b_ih': u(keys[14], (1, 4 * decoder_dim)),
        'w_hh': u(keys[15], (decoder_dim, 4 * decoder_dim)),
        'b_hh': u(keys[16], (1, 4 * decoder_dim)),
        # fcn: weight uniform(-0.1, 0.1), bias zero per init_weights
        'w_fc': u(keys[17], (decoder_dim, vocab_size)),
        'b_fc': jnp.zeros((1, vocab_size), jnp.float32),
    }


# --------------------------------- Main -------------------------------------- #

if __name__ == "__main__":
    key = jax.random.PRNGKey(0)
    B, C, H, W = 2, 3, 32, 32
    patch_size = 8
    embedding_size, attention_dim = 16, 32
    encoder_dim, decoder_dim, vocab_size = 32, 32, 64
    T = 8                                   # caption length -> seq_length = 7
    num_pixels = (H // patch_size) * (W // patch_size)

    k_img, k_cap, k_par = jax.random.split(key, 3)
    images = jax.random.normal(k_img, (B, C, H, W), jnp.float32)
    captions = jax.random.randint(k_cap, (B, T), 0, vocab_size, jnp.int32)
    params = init_params(
        k_par,
        embedding_size=embedding_size,
        attention_dim=attention_dim,
        encoder_dim=encoder_dim,
        decoder_dim=decoder_dim,
        vocab_size=vocab_size,
        patch_dim=C * patch_size * patch_size,
    )

    preds, attn_weights = cnn2rnn_forward(images, captions, params, patch_size)
    jax.block_until_ready((preds, attn_weights))

    assert preds.shape == (B, T - 1, vocab_size)
    assert attn_weights.shape == (B, T - 1, num_pixels)
    print("KERNEL_OK")
</pallas_src>

<mosaic_0001>
module attributes {stable_mosaic.version = 11 : i64} {
  func.func @_matmul_bias_kernel(%arg0: i32, %arg1: i32, %arg2: memref<32x192xf32, #tpu.memory_space<vmem>>, %arg3: memref<192x32xf32, #tpu.memory_space<vmem>>, %arg4: memref<1x32xf32, #tpu.memory_space<vmem>>, %arg5: memref<32x32xf32, #tpu.memory_space<vmem>>) attributes {dimension_semantics = [#tpu.dimension_semantics<parallel>, #tpu.dimension_semantics<parallel>], iteration_bounds = array<i64: 1, 1>, scalar_prefetch = 0 : i64, scratch_operands = 0 : i64, tpu.core_type = #tpu.core_type<tc>, window_params = [{transform_indices = @transform_0, window_bounds = array<i64: 32, 192>}, {transform_indices = @transform_1, window_bounds = array<i64: 192, 32>}, {transform_indices = @transform_2, window_bounds = array<i64: 1, 32>}, {transform_indices = @transform_3, window_bounds = array<i64: 32, 32>}]} {
    %c0 = arith.constant 0 : index
    %c0_0 = arith.constant 0 : index
    %0 = vector.load %arg2[%c0, %c0_0] : memref<32x192xf32, #tpu.memory_space<vmem>>, vector<32x192xf32>
    %c0_1 = arith.constant 0 : index
    %c0_2 = arith.constant 0 : index
    %1 = vector.load %arg3[%c0_1, %c0_2] : memref<192x32xf32, #tpu.memory_space<vmem>>, vector<192x32xf32>
    %cst = arith.constant dense<0.000000e+00> : vector<32x32xf32>
    %2 = tpu.matmul %0, %1, %cst {dimension_numbers = #tpu.dot_dimension_numbers<[1], [0], [0], [1], [0, 0, 1, 1], [], []>} : vector<32x192xf32>, vector<192x32xf32>, vector<32x32xf32> -> vector<32x32xf32>
    %c0_3 = arith.constant 0 : index
    %c0_4 = arith.constant 0 : index
    %3 = vector.load %arg4[%c0_3, %c0_4] : memref<1x32xf32, #tpu.memory_space<vmem>>, vector<1x32xf32>
    %4 = vector.broadcast %3 : vector<1x32xf32> to vector<32x32xf32>
    %5 = arith.addf %2, %4 : vector<32x32xf32>
    %c0_5 = arith.constant 0 : index
    %c0_6 = arith.constant 0 : index
    %6 = vector.load %arg5[%c0_5, %c0_6] : memref<32x32xf32, #tpu.memory_space<vmem>>, vector<32x32xf32>
    tpu.vector_store %arg5[%c0_5, %c0_6], %5 {strides = array<i32>} : memref<32x32xf32, #tpu.memory_space<vmem>>, vector<32x32xf32>,
    return
  }
  func.func @transform_0(%arg0: i32, %arg1: i32) -> (i32, i32) {
    %c0_i32 = arith.constant 0 : i32
    %c0_i32_0 = arith.constant 0 : i32
    return %arg0, %c0_i32 : i32, i32
  }
  func.func @transform_1(%arg0: i32, %arg1: i32) -> (i32, i32) {
    %c0_i32 = arith.constant 0 : i32
    %c0_i32_0 = arith.constant 0 : i32
    return %c0_i32, %arg1 : i32, i32
  }
  func.func @transform_2(%arg0: i32, %arg1: i32) -> (i32, i32) {
    %c0_i32 = arith.constant 0 : i32
    %c0_i32_0 = arith.constant 0 : i32
    return %c0_i32, %arg1 : i32, i32
  }
  func.func @transform_3(%arg0: i32, %arg1: i32) -> (i32, i32) {
    %c0_i32 = arith.constant 0 : i32
    return %arg0, %arg1 : i32, i32
  }
}

</mosaic_0001>

<bundles_post_ra>
// kernel: tpu_custom_call.1
= control target key start
LH: loop header
LB: loop body
LE: loop exit
PB: predicated region body
PF: predicated region fallthrough
CT: control target
= control target key end

     0   :  { %s344_s0 = inlined_call_operand.vmem [shape: f32[32,192], index: 0, kind: input, shape index: {}]   ;;  %s345_s1 = inlined_call_operand.vmem [shape: f32[192,32], index: 1, kind: input, shape index: {}]   ;;  %s346_s2 = inlined_call_operand.vmem [shape: f32[1,32], index: 2, kind: input, shape index: {}]   ;;  %s347_s3 = inlined_call_operand.hbm [shape: f32[32,32], index: 3, kind: output, shape index: {}]  }
   0x1   :  { %v38_v0 = vld [vmem:[%s345_s1 + $0x78] sm:$0xff]  ;;  %v37_v1 = vld [vmem:[%s345_s1 + $0x70] sm:$0xff]  ;;  %v36_v3 = vld [vmem:[%s345_s1 + $0x68] sm:$0xff] }
   0x2   :  { %64 = vmatpush.msra.mxu0 %v38_v0  ;;  %149 = vmatpush.msra.mxu2 %v38_v0  ;;  %v46_v2 = vld [vmem:[%s345_s1 + $0xb8] sm:$0xff]  ;;  %v45_v4 = vld [vmem:[%s345_s1 + $0xb0] sm:$0xff]  ;;  %v44_v5 = vld [vmem:[%s345_s1 + $0xa8] sm:$0xff] }
   0x3   :  { %150 = vmatpush.msra.mxu3 %v38_v0  ;;  %101 = vmatpush.msra.mxu1 %v46_v2  ;;  %v35_v6 = vld [vmem:[%s345_s1 + $0x60] sm:$0xff]  ;;  %v34_v8 = vld [vmem:[%s345_s1 + $0x58] sm:$0xff]  ;;  %v33_v10 = vld [vmem:[%s345_s1 + $0x50] sm:$0xff] }
   0x4   :  { %65 = vmatpush.msra.mxu0 %v37_v1  ;;  %151 = vmatpush.msra.mxu2 %v37_v1  ;;  %v43_v7 = vld [vmem:[%s345_s1 + $0xa0] sm:$0xff]  ;;  %v42_v9 = vld [vmem:[%s345_s1 + $0x98] sm:$0xff]  ;;  %v41_v11 = vld [vmem:[%s345_s1 + $0x90] sm:$0xff] }
   0x5   :  { %152 = vmatpush.msra.mxu3 %v37_v1  ;;  %102 = vmatpush.msra.mxu1 %v45_v4  ;;  %v32_v12 = vld [vmem:[%s345_s1 + $0x48] sm:$0xff] }
   0x6   :  { %66 = vmatpush.msra.mxu0 %v36_v3  ;;  %153 = vmatpush.msra.mxu2 %v36_v3  ;;  %v40_v13 = vld [vmem:[%s345_s1 + $0x88] sm:$0xff] }
   0x7   :  { %154 = vmatpush.msra.mxu3 %v36_v3  ;;  %103 = vmatpush.msra.mxu1 %v44_v5 }
   0x8   :  { %67 = vmatpush.msra.mxu0 %v35_v6  ;;  %155 = vmatpush.msra.mxu2 %v35_v6 }
   0x9   :  { %156 = vmatpush.msra.mxu3 %v35_v6  ;;  %104 = vmatpush.msra.mxu1 %v43_v7 }
   0xa   :  { %68 = vmatpush.msra.mxu0 %v34_v8  ;;  %157 = vmatpush.msra.mxu2 %v34_v8 }
   0xb   :  { %158 = vmatpush.msra.mxu3 %v34_v8  ;;  %105 = vmatpush.msra.mxu1 %v42_v9 }
   0xc   :  { %69 = vmatpush.msra.mxu0 %v33_v10  ;;  %159 = vmatpush.msra.mxu2 %v33_v10 }
   0xd   :  { %8 = vsyncpa [#allocation3], 0  ;;  %160 = vmatpush.msra.mxu3 %v33_v10  ;;  %v31_v14 = vld [vmem:[%s345_s1 + $0x40] sm:$0xff]  ;;  %106 = vmatpush.msra.mxu1 %v41_v11  ;;  %v30_v16 = vld [vmem:[%s345_s1 + $0x38] sm:$0xff]  ;;  %vm51_vm0 = vcmask 523264   ;;  %vm122_vm1 = vcmask 261120  }
   0xe   :  { %70 = vmatpush.msra.mxu0 %v32_v12  ;;  %161 = vmatpush.msra.mxu2 %v32_v12  ;;  %v39_v15 = vld [vmem:[%s345_s1 + $0x80] sm:$0xff]  ;;  %v16_v17 = vld [vmem:[%s344_s0 + $0x8] sm:$0xff]  ;;  %v29_v18 = vld [vmem:[%s345_s1 + $0x30] sm:$0xff]  ;;  %s133_s25 = sshll.u32 %s347_s3, 4  ;;  %s212_s26 = smov 128   ;;  %s134_s25 = int_to_ptr.hbm [resolvable:$true] %s133_s25 }
   0xf   :  { %162 = vmatpush.msra.mxu3 %v32_v12  ;;  %107 = vmatpush.msra.mxu1 %v40_v13  ;;  %v28_v19 = vld [vmem:[%s345_s1 + $0x28] sm:$0xff]  ;;  %v27_v20 = vld [vmem:[%s345_s1 + $0x20] sm:$0xff]  ;;  %v26_v21 = vld [vmem:[%s345_s1 + $0x18] sm:$0xff]  ;;  %s213_s27 = smov 8  }
  0x10   :  { %71 = vmatpush.msra.mxu0 %v31_v14  ;;  %163 = vmatpush.msra.mxu2 %v31_v14  ;;  %v18_v22 = vld [vmem:[%s344_s0 + $0x18] sm:$0xff]  ;;  %v25_v23 = vld [vmem:[%s345_s1 + $0x10] sm:$0xff]  ;;  %v24_v24 = vld [vmem:[%s345_s1 + $0x8] sm:$0xff] }
  0x11   :  { %164 = vmatpush.msra.mxu3 %v31_v14  ;;  %108 = vmatpush.msra.mxu1 %v39_v15  ;;  %v23_v25 = vld [vmem:[%s345_s1] sm:$0xff]  ;;  %v17_v27 = vld [vmem:[%s344_s0 + $0x10] sm:$0xff]  ;;  %v20_v29 = vld [vmem:[%s344_s0 + $0x28] sm:$0xff] }
  0x12   :  { %72 = vmatpush.msra.mxu0 %v30_v16  ;;  %165 = vmatpush.msra.mxu2 %v30_v16  ;;  %v15_v26 = vld [vmem:[%s344_s0] sm:$0xff]  ;;  %v21_v30 = vld [vmem:[%s344_s0 + $0x30] sm:$0xff]  ;;  %v22_v31 = vld [vmem:[%s344_s0 + $0x38] sm:$0xff] }
  0x13   :  { %166 = vmatpush.msra.mxu3 %v30_v16  ;;  %145 = vmatmul.msk.f32.vlgmr.msra.gmra.mxu1 %vm51_vm0, %v16_v17  ;;  %v19_v28 = vld [vmem:[%s344_s0 + $0x20] sm:$0xff]  ;;  %s211_s0 = smov [#allocation2]  }
  0x14   :  { %73 = vmatpush.msra.mxu0 %v29_v18  ;;  %167 = vmatpush.msra.mxu2 %v29_v18  ;;  %v184_v34 = vld [vmem:[%s346_s2] ss:$0 sm:$0xff]  ;;  %s131_s23 = sshll.u32 %s211_s0, 4  ;;  %s132_s23 = int_to_ptr.vmem [resolvable:$true] %s131_s23 }
  0x15   :  { %168 = vmatpush.msra.mxu3 %v29_v18 }
  0x16   :  { %74 = vmatpush.msra.mxu0 %v28_v19  ;;  %169 = vmatpush.msra.mxu2 %v28_v19 }
  0x17   :  { %170 = vmatpush.msra.mxu3 %v28_v19 }
  0x18   :  { %75 = vmatpush.msra.mxu0 %v27_v20  ;;  %171 = vmatpush.msra.mxu2 %v27_v20 }
  0x19   :  { %172 = vmatpush.msra.mxu3 %v27_v20 }
  0x1a   :  { %76 = vmatpush.msra.mxu0 %v26_v21  ;;  %173 = vmatpush.msra.mxu2 %v26_v21 }
  0x1b   :  { %174 = vmatpush.msra.mxu3 %v26_v21  ;;  %146 = vmatmul.msk.f32.gmra.mxu1 %vm51_vm0, %v18_v22 }
  0x1c   :  { %77 = vmatpush.msra.mxu0 %v25_v23  ;;  %175 = vmatpush.msra.mxu2 %v25_v23 }
  0x1d   :  { %176 = vmatpush.msra.mxu3 %v25_v23 }
  0x1e   :  { %78 = vmatpush.msra.mxu0 %v24_v24  ;;  %177 = vmatpush.msra.mxu2 %v24_v24 }
  0x1f   :  { %178 = vmatpush.msra.mxu3 %v24_v24 }
  0x20   :  { %79 = vmatpush.msra.mxu0 %v23_v25  ;;  %179 = vmatpush.msra.mxu2 %v23_v25 }
  0x21   :  { %180 = vmatpush.msra.mxu3 %v23_v25  ;;  %80 = vmatmul.f32.vlgmr.msra.gmra.mxu0 %v15_v26 }
  0x22   :  { %83 = vmatmul.f32.vlgmr.msra.gmra.mxu2 %v17_v27  ;;  %86 = vmatmul.f32.vlgmr.msra.gmra.mxu3 %v19_v28 }
  0x23   :  { %147 = vmatmul.msk.f32.gmra.mxu1 %vm51_vm0, %v20_v29 }
  0x2a   :  { %89 = vmatmul.f32.gmra.mxu3 %v21_v30 }
  0x2b   :  { %148 = vmatmul.msk.f32.gmra.mxu1 %vm51_vm0, %v22_v31 }
  0x90   :  { %v110_v32 = vpop.f32.mrf.mxu1 }
  0x98   :  { %v113_v33 = vpop.f32.mrf.mxu1 }
  0x9e   :  { %v81_v35 = vpop.f32.mrf.mxu0 }
  0x9f   :  { %v82_v36 = vadd.f32 %v184_v34, %v81_v35 }
  0xa0   :  { %v116_v38 = vpop.f32.mrf.mxu1 }
  0xa1   :  { %v111_v37 = vadd.f32 %v110_v32, %v82_v36 }
  0xa3   :  { %123 = vst.msk [vmem:[#allocation2] sm:$0xff] %vm122_vm1, %v111_v37 }
  0xa5   :  { %v84_v39 = vpop.f32.mrf.mxu2  ;;  %v87_v40 = vpop.f32.mrf.mxu3 }
  0xa6   :  { %v85_v41 = vadd.f32 %v184_v34, %v84_v39  ;;  %v88_v42 = vadd.f32 %v184_v34, %v87_v40 }
  0xa8   :  { %v114_v43 = vadd.f32 %v113_v33, %v85_v41  ;;  %v117_v44 = vadd.f32 %v116_v38, %v88_v42  ;;  %v119_v46 = vpop.f32.mrf.mxu1 }
  0xaa   :  { %124 = vst.msk [vmem:[#allocation2 + $0x8] sm:$0xff] %vm122_vm1, %v114_v43 }
  0xab   :  { %125 = vst.msk [vmem:[#allocation2 + $0x10] sm:$0xff] %vm122_vm1, %v117_v44 }
  0xad   :  { %v90_v45 = vpop.f32.mrf.mxu3 }
  0xae   :  { %v91_v47 = vadd.f32 %v184_v34, %v90_v45 }
  0xb0   :  { %v120_v48 = vadd.f32 %v119_v46, %v91_v47 }
  0xb2   :  { %126 = vst.msk [vmem:[#allocation2 + $0x18] sm:$0xff] %vm122_vm1, %v120_v48 }
  0xb3   :  { %139 = dma.vmem_to_hbm [thread:$0]  %s132_s23, 512, %s134_s25, [#allocation3], %s212_s26, %s212_s26, %s213_s27  }
  0xb4   :  { %209 = dma.done.wait [#allocation3], 512  }
  0xb5   :  { %210 = vsyncadd [#allocation3], 4294966784 }
  0xb6   :  { %144 = vsyncpa [#allocation3], 1 }

</bundles_post_ra>
